<compile_context>
chip_gen: v6e
topology: v6e:2x2x1
jax: 0.10.0
libtpu: 0.0.40
codegen_flags: <defaults>
</compile_context>

<pallas_src>
import functools
import math

import jax
import jax.numpy as jnp
from jax import lax
from jax.experimental import pallas as pl
from jax.experimental.pallas import tpu as pltpu


# --------------------------------------------------------------------------
# Generation-dependent tiling configuration
# --------------------------------------------------------------------------

MATMUL_DTYPE = jnp.bfloat16     # MXU operand dtype (accumulation stays f32)
ACT_DTYPE = jnp.bfloat16        # streamed activation dtype (FPN / kv / mf / me)
NEG_INF = -1e30                 # finite "minus infinity" (no NaN hazard)


def _device_kind():
    try:
        return jax.devices()[0].device_kind.lower()
    except Exception:  # pragma: no cover - CPU interpret etc.
        return ""


_KIND = _device_kind()
if ("v5" in _KIND) or ("v6" in _KIND):
    # 128 MiB physical VMEM: spend it on bigger tiles to reach the HBM roofline.
    VMEM_LIMIT = 64 * 1024 * 1024
    TM = 1024                   # row tile for dense kernels
    TN = 512                    # col tile (multiple of 128)
    TK_KV = 2048                # KV tile for flash-style cross attention
    TN_MASK = 4096              # spatial tile for the mask einsum
else:
    # v7x (64 MiB physical / TC) or unknown: stay conservative.
    # (On v7x, spend the bf16 headroom on pl.Buffered(3) pipelining / fp8
    #  weights if accuracy allows - not enabled here.)
    VMEM_LIMIT = 32 * 1024 * 1024
    TM = 512
    TN = 512
    TK_KV = 1024
    TN_MASK = 2048

TH_FPN = 64                     # spatial-row tile for the fused FPN kernel


def _round_up(x, m):
    return (x + m - 1) // m * m


def _choose_tile(dim, target):
    """(padded_dim, tile): full-dim block if small, else target-sized tiles."""
    if dim <= target:
        return dim, dim
    return _round_up(dim, target), target


def _fpn_row_tile(h, target=TH_FPN):
    """Even divisor of h, <= target (full h if it already fits)."""
    if h <= target:
        return h
    for d in range(min(h, target), 1, -1):
        if h % d == 0 and d % 2 == 0:
            return d
    return h


def _cparams(sem):
    return pltpu.CompilerParams(dimension_semantics=sem,
                                vmem_limit_bytes=VMEM_LIMIT)


# --------------------------------------------------------------------------
# Fused tiled linear (1x1 conv / dense):  y = act(x @ w + b)
# --------------------------------------------------------------------------

def _linear_kernel(x_ref, w_ref, b_ref, o_ref, *, activation):
    acc = jnp.dot(x_ref[...].astype(MATMUL_DTYPE),
                  w_ref[...].astype(MATMUL_DTYPE),
                  preferred_element_type=jnp.float32)
    acc = acc + b_ref[...]
    if activation == "relu":
        acc = jnp.maximum(acc, 0.0)
    o_ref[...] = acc.astype(o_ref.dtype)


def linear(x, w, b, *, activation=None, out_dtype=None):
    """(M, K) @ (K, N) + b [ReLU], tiled over M and N, lane-dense output."""
    M, K = x.shape
    N = w.shape[1]
    out_dtype = out_dtype or x.dtype
    Mp, tm = _choose_tile(M, TM)
    if N < 128:
        Np, tn = 128, 128        # lane-dense output tile: pad, slice after
    else:
        Np, tn = _choose_tile(N, TN)

    if Mp != M:
        x = jnp.pad(x, ((0, Mp - M), (0, 0)))
    if Np != N:
        w = jnp.pad(w, ((0, 0), (0, Np - N)))
        b = jnp.pad(b, (0, Np - N))
    b2 = b.reshape(1, Np).astype(jnp.float32)

    # M innermost: the (K, tn) weight tile's block index is constant across
    # consecutive steps, so it stays resident while x streams.
    grid = (Np // tn, Mp // tm)

    out = pl.pallas_call(
        functools.partial(_linear_kernel, activation=activation),
        out_shape=jax.ShapeDtypeStruct((Mp, Np), out_dtype),
        grid=grid,
        in_specs=[
            pl.BlockSpec((tm, K), lambda j, i: (i, 0)),
            pl.BlockSpec((K, tn), lambda j, i: (0, j)),
            pl.BlockSpec((1, tn), lambda j, i: (0, j)),
        ],
        out_specs=pl.BlockSpec((tm, tn), lambda j, i: (i, j)),
        compiler_params=_cparams(("parallel", "parallel")),
    )(x, w, b2)

    if Mp != M or Np != N:
        out = out[:M, :N]
    return out


# --------------------------------------------------------------------------
# Fused FPN lateral conv + 2x nearest upsample residual (channel-last):
#   out = x @ w + b + upsample2x(y_prev)
# The residual BlockSpec indexes the half-resolution source tile; the 2x
# broadcast happens in VMEM (no HBM round trip of the upsampled tensor).
# --------------------------------------------------------------------------

def _fpn_kernel(x_ref, w_ref, b_ref, yp_ref, o_ref):
    x = x_ref[0].astype(MATMUL_DTYPE)                    # (th, W, Cin)
    th, W, Cin = x.shape
    Cout = w_ref.shape[1]
    acc = jnp.dot(x.reshape(th * W, Cin),
                  w_ref[...].astype(MATMUL_DTYPE),
                  preferred_element_type=jnp.float32).reshape(th, W, Cout)
    yp = yp_ref[0].astype(jnp.float32)                   # (th//2, W//2, Cout)
    up = jnp.broadcast_to(yp[:, None, :, None, :],
                          (th // 2, 2, W // 2, 2, Cout)).reshape(th, W, Cout)
    o_ref[0] = (acc + b_ref[...] + up).astype(o_ref.dtype)


def fpn_lateral_fused(x_nhwc, w, b, y_prev):
    """x: (BV, H, W, Cin), y_prev: (BV, H//2, W//2, Cout) -> (BV, H, W, Cout)."""
    BV, H, W, Cin = x_nhwc.shape
    Cout = w.shape[1]
    assert H % 2 == 0 and W % 2 == 0
    assert y_prev.shape == (BV, H // 2, W // 2, Cout)
    th = _fpn_row_tile(H)
    grid = (BV, H // th)
    return pl.pallas_call(
        _fpn_kernel,
        out_shape=jax.ShapeDtypeStruct((BV, H, W, Cout), ACT_DTYPE),
        grid=grid,
        in_specs=[
            pl.BlockSpec((1, th, W, Cin), lambda bv, h: (bv, h, 0, 0)),
            pl.BlockSpec((Cin, Cout), lambda bv, h: (0, 0)),
            pl.BlockSpec((1, Cout), lambda bv, h: (0, 0)),
            pl.BlockSpec((1, th // 2, W // 2, Cout), lambda bv, h: (bv, h, 0, 0)),
        ],
        out_specs=pl.BlockSpec((1, th, W, Cout), lambda bv, h: (bv, h, 0, 0)),
        compiler_params=_cparams(("parallel", "parallel")),
    )(x_nhwc, w, b.reshape(1, Cout).astype(jnp.float32), y_prev)


# --------------------------------------------------------------------------
# Fused 2-layer MLP with ReLU (mask-embedding head)
# --------------------------------------------------------------------------

def _mlp_kernel(x_ref, w1_ref, b1_ref, w2_ref, b2_ref, o_ref):
    h = jnp.dot(x_ref[...].astype(MATMUL_DTYPE),
                w1_ref[...].astype(MATMUL_DTYPE),
                preferred_element_type=jnp.float32) + b1_ref[...]
    h = jnp.maximum(h, 0.0)
    o = jnp.dot(h.astype(MATMUL_DTYPE),
                w2_ref[...].astype(MATMUL_DTYPE),
                preferred_element_type=jnp.float32) + b2_ref[...]
    o_ref[...] = o.astype(o_ref.dtype)


def mlp2(x, w1, b1, w2, b2, *, out_dtype=None):
    """relu(x @ w1 + b1) @ w2 + b2, fused in one kernel, tiled over rows."""
    M, D = x.shape
    H = w1.shape[1]
    N = w2.shape[1]
    out_dtype = out_dtype or x.dtype
    Np = 128 if N < 128 else N          # lane-dense output
    if Np != N:
        w2 = jnp.pad(w2, ((0, 0), (0, Np - N)))
        b2 = jnp.pad(b2, (0, Np - N))
    Mp, tm = _choose_tile(M, TM)
    if Mp != M:
        x = jnp.pad(x, ((0, Mp - M), (0, 0)))
    out = pl.pallas_call(
        _mlp_kernel,
        out_shape=jax.ShapeDtypeStruct((Mp, Np), out_dtype),
        grid=(Mp // tm,),
        in_specs=[
            pl.BlockSpec((tm, D), lambda i: (i, 0)),
            pl.BlockSpec((D, H), lambda i: (0, 0)),
            pl.BlockSpec((1, H), lambda i: (0, 0)),
            pl.BlockSpec((H, Np), lambda i: (0, 0)),
            pl.BlockSpec((1, Np), lambda i: (0, 0)),
        ],
        out_specs=pl.BlockSpec((tm, Np), lambda i: (i, 0)),
        compiler_params=_cparams(("parallel",)),
    )(x, w1, b1.reshape(1, H).astype(jnp.float32),
      w2, b2.reshape(1, Np).astype(jnp.float32))
    if Mp != M or Np != N:
        out = out[:M, :N]
    return out


# --------------------------------------------------------------------------
# Flash-style single-head cross attention, fused level-embedding + residual:
#   out = q + softmax(q (kv+emb)^T / sqrt(D)) (kv+emb)
# --------------------------------------------------------------------------

def _flash_attn_kernel(q_ref, kv_ref, emb_ref, o_ref, m_sc, l_sc, acc_sc,
                       *, scale, n_kv, need_mask):
    ki = pl.program_id(1)

    @pl.when(ki == 0)
    def _():
        m_sc[...] = jnp.full_like(m_sc, NEG_INF)
        l_sc[...] = jnp.zeros_like(l_sc)
        acc_sc[...] = jnp.zeros_like(acc_sc)

    q = q_ref[0].astype(MATMUL_DTYPE)                                  # (Q, D)
    kv = (kv_ref[0].astype(jnp.float32)
          + emb_ref[...]).astype(MATMUL_DTYPE)                         # (tk, D)

    # dot_general contracting last dims -> no explicit K transpose (XLU).
    s = lax.dot_general(q, kv, (((1,), (1,)), ((), ())),
                        preferred_element_type=jnp.float32) * scale    # (Q, tk)
    if need_mask:
        col = ki * kv.shape[0] + lax.broadcasted_iota(jnp.int32, s.shape, 1)
        valid = col < n_kv
        s = jnp.where(valid, s, NEG_INF)

    # m/l scratch are lane-wide (Q, 128): unmasked full-width stores.
    m_prev = jnp.max(m_sc[...], axis=-1, keepdims=True)                # (Q, 1)
    row_max = jnp.max(s, axis=-1, keepdims=True)
    m_new = jnp.maximum(m_prev, row_max)
    alpha = jnp.exp(m_prev - m_new)
    p = jnp.exp(s - m_new)
    if need_mask:
        p = jnp.where(valid, p, 0.0)      # robust even for all-padding tiles

    l_prev = jnp.max(l_sc[...], axis=-1, keepdims=True)
    l_new = alpha * l_prev + jnp.sum(p, axis=-1, keepdims=True)
    acc_sc[...] = alpha * acc_sc[...] + jnp.dot(
        p.astype(MATMUL_DTYPE), kv, preferred_element_type=jnp.float32)
    m_sc[...] = jnp.broadcast_to(m_new, m_sc.shape)
    l_sc[...] = jnp.broadcast_to(l_new, l_sc.shape)

    @pl.when(ki == pl.num_programs(1) - 1)
    def _():
        l_fin = jnp.max(l_sc[...], axis=-1, keepdims=True)
        o_ref[0] = (q_ref[0].astype(jnp.float32)
                    + acc_sc[...] * pl.reciprocal(l_fin, approx=True)
                    ).astype(o_ref.dtype)


def cross_attention_residual(q, kv, emb):
    """q: (B, Q, D) f32, kv: (B, N, D) bf16, emb: (D,) -> q + attn(q, kv+emb)."""
    B, Q, D = q.shape
    N = kv.shape[1]
    scale = 1.0 / math.sqrt(D)
    Np, tk = _choose_tile(N, TK_KV)
    need_mask = Np != N
    if need_mask:
        kv = jnp.pad(kv, ((0, 0), (0, Np - N), (0, 0)))
    return pl.pallas_call(
        functools.partial(_flash_attn_kernel, scale=scale, n_kv=N,
                          need_mask=need_mask),
        out_shape=jax.ShapeDtypeStruct((B, Q, D), q.dtype),
        grid=(B, Np // tk),
        in_specs=[
            pl.BlockSpec((1, Q, D), lambda b, k: (b, 0, 0)),
            pl.BlockSpec((1, tk, D), lambda b, k: (b, k, 0)),
            pl.BlockSpec((1, D), lambda b, k: (0, 0)),
        ],
        out_specs=pl.BlockSpec((1, Q, D), lambda b, k: (b, 0, 0)),
        scratch_shapes=[
            pltpu.VMEM((Q, 128), jnp.float32),
            pltpu.VMEM((Q, 128), jnp.float32),
            pltpu.VMEM((Q, D), jnp.float32),
        ],
        compiler_params=_cparams(("parallel", "arbitrary")),
    )(q, kv, emb.reshape(1, D).astype(jnp.float32))


# --------------------------------------------------------------------------
# Mask prediction einsum, level axis folded into M:
#   me: (B, L*Q, C), mf: (B, N, C) -> (B, L*Q, N)
# --------------------------------------------------------------------------

def _mask_bmm_kernel(me_ref, mf_ref, o_ref):
    me = me_ref[0].astype(MATMUL_DTYPE)          # (L*Q, C)
    mf = mf_ref[0].astype(MATMUL_DTYPE)          # (tn, C)
    o_ref[0] = lax.dot_general(
        me, mf, (((1,), (1,)), ((), ())),
        preferred_element_type=jnp.float32).astype(o_ref.dtype)


def mask_bmm(me, mf):
    """me: (B, LQ, C), mf: (B, N, C) -> (B, LQ, N) f32, tiled over N.

    mf (the largest predictor tensor) is streamed from HBM exactly once;
    all decoder levels share the MXU M-fill (LQ rows)."""
    B, LQ, C = me.shape
    N = mf.shape[1]
    Np, tn = _choose_tile(N, TN_MASK)
    if Np != N:
        mf = jnp.pad(mf, ((0, 0), (0, Np - N), (0, 0)))
    out = pl.pallas_call(
        _mask_bmm_kernel,
        out_shape=jax.ShapeDtypeStruct((B, LQ, Np), jnp.float32),
        grid=(B, Np // tn),
        in_specs=[
            pl.BlockSpec((1, LQ, C), lambda b, n: (b, 0, 0)),
            pl.BlockSpec((1, tn, C), lambda b, n: (b, n, 0)),
        ],
        out_specs=pl.BlockSpec((1, LQ, tn), lambda b, n: (b, 0, n)),
        compiler_params=_cparams(("parallel", "parallel")),
    )(me, mf)
    return out[..., :N] if Np != N else out


# --------------------------------------------------------------------------
# Parameter construction (deterministic, synthetic; weights pre-cast to bf16)
# --------------------------------------------------------------------------

def init_params(key, in_channels, conv_dim, mask_dim, hidden_dim,
                num_queries, num_classes, num_levels=3):
    keys = jax.random.split(key, 32)
    ki = iter(range(32))

    def dense(k, cin, cout, scale=0.02):
        w = (scale * jax.random.normal(k, (cin, cout), jnp.float32))
        return w.astype(MATMUL_DTYPE), jnp.zeros((cout,), jnp.float32)

    p = {}
    # pixel decoder: lateral 1x1 convs (res2..res5) + mask-features 1x1 conv
    p["lat"] = [dense(keys[next(ki)], c, conv_dim) for c in in_channels]
    p["mask_proj"] = dense(keys[next(ki)], conv_dim, mask_dim)
    # predictor
    p["query_feat"] = 0.02 * jax.random.normal(
        keys[next(ki)], (num_queries, hidden_dim), jnp.float32)
    p["level_embed"] = 0.02 * jax.random.normal(
        keys[next(ki)], (num_levels, hidden_dim), jnp.float32)
    p["class_head"] = dense(keys[next(ki)], hidden_dim, num_classes)
    p["mask_mlp1"] = dense(keys[next(ki)], hidden_dim, hidden_dim)
    p["mask_mlp2"] = dense(keys[next(ki)], hidden_dim, mask_dim)
    return p


# --------------------------------------------------------------------------
# ODINHead forward (2D path)
# --------------------------------------------------------------------------

def odin_head_forward(params, features, shape):
    """features: dict res2..res5 of NCHW (B*V, C_i, H_i, W_i); shape=(B, V)."""
    B, V = shape
    num_classes = params["class_head"][0].shape[1]
    Q, D = params["query_feat"].shape
    mask_dim = params["mask_proj"][0].shape[1]
    conv_dim = params["lat"][0][0].shape[1]

    # Single NCHW -> NHWC conversion at the PyTorch boundary; everything
    # downstream is channel-last so 1x1 convs / attention / mask einsum need
    # no further transposes (later reshapes are free views).
    feats = {k: jnp.transpose(v, (0, 2, 3, 1)) for k, v in features.items()}

    # ---------------- pixel decoder (FPN; 2x upsample fused into the lateral
    # conv's residual path, activations emitted as bf16) ----------------
    x5 = feats["res5"]
    BV, H5, W5, _ = x5.shape
    y5 = linear(x5.reshape(BV * H5 * W5, x5.shape[-1]), *params["lat"][3],
                out_dtype=ACT_DTYPE).reshape(BV, H5, W5, conv_dim)
    y4 = fpn_lateral_fused(feats["res4"], *params["lat"][2], y5)
    y3 = fpn_lateral_fused(feats["res3"], *params["lat"][1], y4)
    y2 = fpn_lateral_fused(feats["res2"], *params["lat"][0], y3)

    Hm, Wm = y2.shape[1], y2.shape[2]
    mask_flat = linear(y2.reshape(BV * Hm * Wm, conv_dim),
                       *params["mask_proj"], out_dtype=ACT_DTYPE)
    mf = mask_flat.reshape(B, V * Hm * Wm, mask_dim)     # channel-last view

    multi_scale = [y5, y4, y3]                            # res5 -> res3

    # ---------------- transformer predictor ----------------
    q = jnp.broadcast_to(params["query_feat"][None], (B, Q, D))
    q_levels = []
    for lvl, y in enumerate(multi_scale):
        kv = y.reshape(B, V * y.shape[1] * y.shape[2], conv_dim)  # free view
        q = cross_attention_residual(q, kv, params["level_embed"][lvl])
        q_levels.append(q)

    # Prediction heads batched across all decoder levels (aux + final):
    # one class-head launch, one fused mask-MLP launch, one mask-einsum launch.
    L = len(q_levels)
    q_all = jnp.stack(q_levels, axis=1)                   # (B, L, Q, D)
    q_flat = q_all.reshape(B * L * Q, D)
    logits = linear(q_flat, *params["class_head"],
                    out_dtype=jnp.float32).reshape(B, L, Q, num_classes)
    me = mlp2(q_flat, *params["mask_mlp1"], *params["mask_mlp2"],
              out_dtype=ACT_DTYPE).reshape(B, L * Q, mask_dim)
    masks = mask_bmm(me, mf).reshape(B, L, Q, V, Hm, Wm)

    aux_outputs = [{"pred_logits": logits[:, l], "pred_masks": masks[:, l]}
                   for l in range(L - 1)]
    return {
        "pred_logits": logits[:, L - 1],
        "pred_masks": masks[:, L - 1],
        "aux_outputs": aux_outputs,
    }


# --------------------------------------------------------------------------
# Demo
# --------------------------------------------------------------------------

if __name__ == "__main__":
    key = jax.random.PRNGKey(0)
    k_feat, k_par = jax.random.split(key)

    B, V = 2, 2                         # batch, num_views
    in_channels = [4, 8, 16, 32]        # res2..res5
    conv_dim = hidden_dim = mask_dim = 32
    num_queries = 8
    num_classes = 10

    # features: NCHW, strides 4/8/16/32 of a 64x64 image -> 16,8,4,2 spatial
    sizes = [16, 8, 4, 2]
    fkeys = jax.random.split(k_feat, 4)
    features = {
        f"res{i + 2}": jax.random.normal(
            fkeys[i], (B * V, in_channels[i], sizes[i], sizes[i]), jnp.float32)
        for i in range(4)
    }

    params = init_params(k_par, in_channels, conv_dim, mask_dim, hidden_dim,
                         num_queries, num_classes)

    preds = odin_head_forward(params, features, shape=(B, V))
    jax.block_until_ready(preds)

    assert preds["pred_logits"].shape == (B, num_queries, num_classes)
    assert preds["pred_masks"].shape == (B, num_queries, V, 16, 16)
    assert len(preds["aux_outputs"]) == 2
    for aux in preds["aux_outputs"]:
        assert aux["pred_logits"].shape == (B, num_queries, num_classes)
        assert aux["pred_masks"].shape == (B, num_queries, V, 16, 16)
    assert bool(jnp.all(jnp.isfinite(preds["pred_masks"])))
    assert bool(jnp.all(jnp.isfinite(preds["pred_logits"])))

    print("KERNEL_OK")
</pallas_src>

<mosaic_0001>
module attributes {stable_mosaic.version = 11 : i64} {
  func.func @_linear_kernel(%arg0: i32, %arg1: i32, %arg2: memref<16x32xf32, #tpu.memory_space<vmem>>, %arg3: memref<32x128xbf16, #tpu.memory_space<vmem>>, %arg4: memref<1x128xf32, #tpu.memory_space<vmem>>, %arg5: memref<16x128xbf16, #tpu.memory_space<vmem>>) attributes {dimension_semantics = [#tpu.dimension_semantics<parallel>, #tpu.dimension_semantics<parallel>], iteration_bounds = array<i64: 1, 1>, scalar_prefetch = 0 : i64, scratch_operands = 0 : i64, tpu.core_type = #tpu.core_type<tc>, window_params = [{transform_indices = @transform_0, window_bounds = array<i64: 16, 32>}, {transform_indices = @transform_1, window_bounds = array<i64: 32, 128>}, {transform_indices = @transform_2, window_bounds = array<i64: 1, 128>}, {transform_indices = @transform_3, window_bounds = array<i64: 16, 128>}]} {
    %c0 = arith.constant 0 : index
    %c0_0 = arith.constant 0 : index
    %0 = vector.load %arg2[%c0, %c0_0] : memref<16x32xf32, #tpu.memory_space<vmem>>, vector<16x32xf32>
    %1 = arith.truncf %0 : vector<16x32xf32> to vector<16x32xbf16>
    %c0_1 = arith.constant 0 : index
    %c0_2 = arith.constant 0 : index
    %2 = vector.load %arg3[%c0_1, %c0_2] : memref<32x128xbf16, #tpu.memory_space<vmem>>, vector<32x128xbf16>
    %cst = arith.constant dense<0.000000e+00> : vector<16x128xf32>
    %3 = tpu.matmul %1, %2, %cst {dimension_numbers = #tpu.dot_dimension_numbers<[1], [0], [0], [1], [0, 0, 1, 1], [], []>} : vector<16x32xbf16>, vector<32x128xbf16>, vector<16x128xf32> -> vector<16x128xf32>
    %c0_3 = arith.constant 0 : index
    %c0_4 = arith.constant 0 : index
    %4 = vector.load %arg4[%c0_3, %c0_4] : memref<1x128xf32, #tpu.memory_space<vmem>>, vector<1x128xf32>
    %5 = vector.broadcast %4 : vector<1x128xf32> to vector<16x128xf32>
    %6 = arith.addf %3, %5 : vector<16x128xf32>
    %7 = arith.truncf %6 : vector<16x128xf32> to vector<16x128xbf16>
    %c0_5 = arith.constant 0 : index
    %c0_6 = arith.constant 0 : index
    %8 = vector.load %arg5[%c0_5, %c0_6] : memref<16x128xbf16, #tpu.memory_space<vmem>>, vector<16x128xbf16>
    tpu.vector_store %arg5[%c0_5, %c0_6], %7 {strides = array<i32>} : memref<16x128xbf16, #tpu.memory_space<vmem>>, vector<16x128xbf16>,
    return
  }
  func.func @transform_0(%arg0: i32, %arg1: i32) -> (i32, i32) {
    %c0_i32 = arith.constant 0 : i32
    %c0_i32_0 = arith.constant 0 : i32
    return %arg1, %c0_i32 : i32, i32
  }
  func.func @transform_1(%arg0: i32, %arg1: i32) -> (i32, i32) {
    %c0_i32 = arith.constant 0 : i32
    %c0_i32_0 = arith.constant 0 : i32
    return %c0_i32, %arg0 : i32, i32
  }
  func.func @transform_2(%arg0: i32, %arg1: i32) -> (i32, i32) {
    %c0_i32 = arith.constant 0 : i32
    %c0_i32_0 = arith.constant 0 : i32
    return %c0_i32, %arg0 : i32, i32
  }
  func.func @transform_3(%arg0: i32, %arg1: i32) -> (i32, i32) {
    %c0_i32 = arith.constant 0 : i32
    return %arg1, %arg0 : i32, i32
  }
}

</mosaic_0001>

<bundles_post_ra>
// kernel: tpu_custom_call.1
= control target key start
LH: loop header
LB: loop body
LE: loop exit
PB: predicated region body
PF: predicated region fallthrough
CT: control target
= control target key end

     0   :  { %8 = vsyncpa [#allocation3], 0  ;;  %s291_s0 = inlined_call_operand.hbm [shape: f32[16,32], index: 0, kind: input, shape index: {}]   ;;  %s292_s1 = inlined_call_operand.hbm [shape: bf16[32,128], index: 1, kind: input, shape index: {}]   ;;  %s293_s2 = inlined_call_operand.vmem [shape: f32[1,128], index: 2, kind: input, shape index: {}]   ;;  %s294_s3 = inlined_call_operand.hbm [shape: bf16[16,128], index: 3, kind: output, shape index: {}]  }
   0x1   :  { %9 = vsyncpa [#allocation6], 0 }
   0x2   :  { %10 = vsyncpa [#allocation4], 0  ;;  %s244_s12 = smov [#allocation2]  }
   0x3   :  { %s16_s13 = sshll.u32 %s244_s12, 4  ;;  %s17_s13 = int_to_ptr.vmem [resolvable:$true] %s16_s13 }
   0x4   :  { %s186_s14 = scalar_lea.vmem %s17_s13, 256  ;;  %p191_p1 = scmp.lt.s32.totalorder %s17_s13, %s17_s13 }
   0x5   :  { %p187_p0 = scmp.ne.s32.totalorder %s17_s13, %s186_s14  ;;  %p192_p2 = scmp.lt.s32.totalorder %s186_s14, %s186_s14 }
   0x7   :  { %p193_p3 = por %p192_p2, %p191_p1 }
   0x9   :  { %p194_p4 = pnand %p193_p3, %p187_p0 }
   0xb   :  { %197 = shalt.err (!%p194_p4)
}
   0xc   :  { %s245_s15 = smov 128   ;;  %s246_s16 = smov 8  }
   0xd   :  { %22 = dma.hbm_to_vmem [thread:$0]  %s291_s0, 256, %s17_s13, [#allocation3], %s245_s15, %s245_s15, %s246_s16  }
   0xe   :  { %s247_s19 = smov [#allocation5]  }
   0xf   :  { %s28_s20 = sshll.u32 %s247_s19, 4  ;;  %s29_s20 = int_to_ptr.vmem [resolvable:$true] %s28_s20 }
  0x10   :  { %s206_s21 = scalar_lea.vmem %s29_s20, 256  ;;  %p211_p6 = scmp.lt.s32.totalorder %s29_s20, %s29_s20 }
  0x11   :  { %p207_p5 = scmp.ne.s32.totalorder %s29_s20, %s206_s21  ;;  %p212_p7 = scmp.lt.s32.totalorder %s206_s21, %s206_s21 }
  0x13   :  { %p213_p8 = por %p212_p7, %p211_p6 }
  0x15   :  { %p214_p9 = pnand %p213_p8, %p207_p5 }
  0x17   :  { %217 = shalt.err (!%p214_p9)
}
  0x18   :  { %s248_s22 = smov 64   ;;  %s249_s23 = smov 4  }
  0x19   :  { %34 = dma.hbm_to_vmem [thread:$0]  %s292_s1, 256, %s29_s20, [#allocation6], %s248_s22, %s248_s22, %s249_s23  }
  0x1a   :  { %238 = dma.done.wait [#allocation3], 256  }
  0x1b   :  { %239 = vsyncadd [#allocation3], 4294967040 }
  0x1c   :  { %240 = dma.done.wait [#allocation6], 256  }
  0x1d   :  { %241 = vsyncadd [#allocation6], 4294967040  ;;  %v250_v0 = vmov 0.0   ;;  %vm251_vm0 = vmmov 0   ;;  %v176_v1 = vld [vmem:[#allocation5 + $0x8] sm:$0xff]   ;;  %v177_v2 = vld [vmem:[#allocation5] sm:$0xff]  }
  0x1e   :  { %159 = vmatprep.subr.bf16.mxu0 %v250_v0  ;;  %163 = vmatprep.mubr.msk.bf16.mxu0 %vm251_vm0, %v250_v0  ;;  %v44_v3 = vld [vmem:[#allocation2] sm:$0xff]  ;;  %v45_v4 = vld [vmem:[#allocation2 + $0x8] sm:$0xff]  ;;  %vm70_vm1 = vcmask 261120   ;;  %s252_s26 = smov [#allocation7]  }
  0x1f   :  { %160 = vmatpush3.bf16.msra.mxu0 %v176_v1  ;;  %v46_v5 = vpack.c.bf16 %v45_v4, %v44_v3  ;;  %v143_v7 = vld [vmem:[%s293_s2] ss:$0 sm:$0xff]  ;;  %s130_s27 = sshll.u32 %s252_s26, 4  ;;  %s131_s27 = int_to_ptr.vmem [resolvable:$true] %s130_s27 }
  0x20   :  { %161 = vmatprep.subr.bf16.mxu0 %v250_v0  ;;  %s218_s28 = scalar_lea.vmem %s131_s27, 128  ;;  %p223_p11 = scmp.lt.s32.totalorder %s131_s27, %s131_s27 }
  0x21   :  { %p219_p10 = scmp.ne.s32.totalorder %s131_s27, %s218_s28  ;;  %p224_p12 = scmp.lt.s32.totalorder %s218_s28, %s218_s28 }
  0x23   :  { %162 = vmatpush3.bf16.msra.mxu0 %v177_v2  ;;  %p225_p13 = por %p224_p12, %p223_p11 }
  0x25   :  { %p226_p0 = pnand %p225_p13, %p219_p10 }
  0x26   :  { %164 = vmatmul.mubr.msk.bf16.vlgmr.msra.gmra.mxu0 %vm70_vm1, %v46_v5 }
  0xe6   :  { %v108_v6 = vpop.f32.mrf.mxu0 }
  0xe7   :  { %v109_v10 = vadd.f32 %v143_v7, %v108_v6 }
  0xe8   :  { %v165_v8 = vpop.f32.mrf.mxu0 }
  0xea   :  { %v111_v9 = vpop.f32.mrf.mxu0 }
  0xeb   :  { %v112_v11 = vadd.f32 %v143_v7, %v111_v9 }
  0xec   :  { %v166_v12 = vpop.f32.mrf.mxu0 }
  0xed   :  { %v154_v13 = vpack.c.bf16 %v112_v11, %v109_v10 }
  0xef   :  { %155 = vst [vmem:[#allocation7] sm:$0xff] %v154_v13  }
  0xf0   :  { %229 = shalt.err (!%p226_p0)
}
  0xf1   :  { %136 = dma.vmem_to_hbm [thread:$0]  %s131_s27, 128, %s294_s3, [#allocation4], %s248_s22, %s248_s22, %s249_s23  }
  0xf2   :  { %242 = dma.done.wait [#allocation4], 128  }
  0xf3   :  { %243 = vsyncadd [#allocation4], 4294967168 }
  0xf4   :  { %140 = vsyncpa [#allocation3], 1 }
  0xf5   :  { %141 = vsyncpa [#allocation6], 1 }
  0xf6   :  { %142 = vsyncpa [#allocation4], 1 }

</bundles_post_ra>
